<compile_context>
chip_gen: v7x
topology: tpu7x:2x2x1
jax: 0.10.0
libtpu: 0.0.40
codegen_flags: <defaults>
</compile_context>

<pallas_src>
import functools

import jax
import jax.numpy as jnp
from jax.experimental import pallas as pl
from jax.experimental.pallas import tpu as pltpu

HIDDEN1 = 128
HIDDEN2 = 64
HEAD_PAD = 128  # fused (mean ++ value) head padded to a lane-dense 128 columns


def _round_up(x, m):
    return ((x + m - 1) // m) * m


def actor_critic_kernel(state_ref, w1_ref, b1_ref, w2_ref, b2_ref,
                        wh_ref, bh_ref, out_ref):
    x = state_ref[...]                                                  # [TB, S]

    # fc1 + relu
    h1 = jnp.dot(x, w1_ref[...], preferred_element_type=jnp.float32)
    h1 = jnp.maximum(h1 + b1_ref[...], 0.0)                             # [TB, 128]

    # fc2 + relu
    h2 = jnp.dot(h1, w2_ref[...], preferred_element_type=jnp.float32)
    h2 = jnp.maximum(h2 + b2_ref[...], 0.0)                             # [TB, 64]

    # fused (mean ++ value ++ zero-pad) head -> single lane-dense store
    out_ref[...] = jnp.dot(h2, wh_ref[...],
                           preferred_element_type=jnp.float32) + bh_ref[...]


@functools.partial(jax.jit, static_argnames=("block_b",))
def actor_critic_forward(state, params, *, block_b=2048):
    """state: [B, state_dim] float32.

    Returns (mean [B, A], std [A], value [B, 1]) matching the PyTorch module.
    """
    B, S = state.shape
    A = params["wm"].shape[1]

    # ---- fused head, zero-padded to a 128-lane output block --------------
    head_w = jnp.concatenate([params["wm"], params["wc"]], axis=1)      # [64, A+1]
    head_b = jnp.concatenate([params["bm"], params["bc"]], axis=1)      # [1, A+1]
    pad = HEAD_PAD - (A + 1)
    head_w = jnp.pad(head_w, ((0, 0), (0, pad)))                        # [64, 128]
    head_b = jnp.pad(head_b, ((0, 0), (0, pad)))                        # [1, 128]

    # ---- batch tiling (sublane-aligned), pad B to a tile multiple --------
    TB = _round_up(min(block_b, max(B, 8)), 8)
    Bp = _round_up(B, TB)
    if Bp != B:
        state = jnp.pad(state, ((0, Bp - B), (0, 0)))
    grid = (Bp // TB,)

    const = lambda i: (0, 0)  # weights/biases: same block every step (VMEM-resident)

    out = pl.pallas_call(
        actor_critic_kernel,
        out_shape=jax.ShapeDtypeStruct((Bp, HEAD_PAD), jnp.float32),
        grid=grid,
        in_specs=[
            pl.BlockSpec((TB, S), lambda i: (i, 0)),                    # state tile
            pl.BlockSpec((S, HIDDEN1), const),                          # w1
            pl.BlockSpec((1, HIDDEN1), const),                          # b1
            pl.BlockSpec((HIDDEN1, HIDDEN2), const),                    # w2
            pl.BlockSpec((1, HIDDEN2), const),                          # b2
            pl.BlockSpec((HIDDEN2, HEAD_PAD), const),                   # fused head W
            pl.BlockSpec((1, HEAD_PAD), const),                         # fused head b
        ],
        out_specs=pl.BlockSpec((TB, HEAD_PAD), lambda i: (i, 0)),
        compiler_params=pltpu.CompilerParams(
            dimension_semantics=("parallel",),
        ),
    )(state, params["w1"], params["b1"], params["w2"], params["b2"],
      head_w, head_b)

    out = out[:B]
    mean = out[:, :A]
    value = out[:, A:A + 1]
    # std is input-independent: compute once in the wrapper, not per grid step.
    std = jnp.exp(params["log_std"])[0]                                 # [A]
    return mean, std, value


def init_params(key, state_dim, action_dim):
    """Deterministic synthetic parameters (PyTorch-Linear-like uniform init)."""
    ks = jax.random.split(key, 8)

    def linear(kw, kb, fan_in, fan_out):
        bound = 1.0 / jnp.sqrt(fan_in)
        w = jax.random.uniform(kw, (fan_in, fan_out), jnp.float32, -bound, bound)
        b = jax.random.uniform(kb, (1, fan_out), jnp.float32, -bound, bound)
        return w, b

    w1, b1 = linear(ks[0], ks[1], state_dim, HIDDEN1)
    w2, b2 = linear(ks[2], ks[3], HIDDEN1, HIDDEN2)
    wm, bm = linear(ks[4], ks[5], HIDDEN2, action_dim)
    wc, bc = linear(ks[6], ks[7], HIDDEN2, 1)
    log_std = jnp.zeros((1, action_dim), jnp.float32)  # nn.Parameter(torch.zeros(A))
    return dict(w1=w1, b1=b1, w2=w2, b2=b2, wm=wm, bm=bm, wc=wc, bc=bc,
                log_std=log_std)


def reference_forward(state, params):
    x = jnp.maximum(state @ params["w1"] + params["b1"], 0.0)
    x = jnp.maximum(x @ params["w2"] + params["b2"], 0.0)
    mean = x @ params["wm"] + params["bm"]
    std = jnp.exp(params["log_std"])[0]
    value = x @ params["wc"] + params["bc"]
    return mean, std, value


def _check(state, params, **kw):
    mean, std, value = actor_critic_forward(state, params, **kw)
    jax.block_until_ready((mean, std, value))
    r_mean, r_std, r_value = reference_forward(state, params)
    B = state.shape[0]
    A = params["wm"].shape[1]
    assert mean.shape == (B, A)
    assert std.shape == (A,)
    assert value.shape == (B, 1)
    assert jnp.allclose(mean, r_mean, atol=1e-5, rtol=1e-5)
    assert jnp.allclose(std, r_std, atol=1e-5, rtol=1e-5)
    assert jnp.allclose(value, r_value, atol=1e-5, rtol=1e-5)


if __name__ == "__main__":
    state_dim, action_dim = 8, 4

    key = jax.random.PRNGKey(0)
    k_param, k_small, k_big = jax.random.split(key, 3)
    params = init_params(k_param, state_dim, action_dim)

    # Small demo case (single grid step, tile padded to 8 rows).
    state_small = jax.random.normal(k_small, (8, state_dim), jnp.float32)
    _check(state_small, params)

    # Exercise the tiled / padded path: 300 rows, 128-row tiles -> grid=(3,)
    # with the last tile partially padded.
    state_big = jax.random.normal(k_big, (300, state_dim), jnp.float32)
    _check(state_big, params, block_b=128)

    print("KERNEL_OK")
</pallas_src>

<mosaic_0001>
module attributes {stable_mosaic.version = 11 : i64} {
  func.func @actor_critic_kernel(%arg0: i32, %arg1: memref<8x8xf32, #tpu.memory_space<vmem>>, %arg2: memref<8x128xf32, #tpu.memory_space<vmem>>, %arg3: memref<1x128xf32, #tpu.memory_space<vmem>>, %arg4: memref<128x64xf32, #tpu.memory_space<vmem>>, %arg5: memref<1x64xf32, #tpu.memory_space<vmem>>, %arg6: memref<64x128xf32, #tpu.memory_space<vmem>>, %arg7: memref<1x128xf32, #tpu.memory_space<vmem>>, %arg8: memref<8x128xf32, #tpu.memory_space<vmem>>) attributes {dimension_semantics = [#tpu.dimension_semantics<parallel>], iteration_bounds = array<i64: 1>, scalar_prefetch = 0 : i64, scratch_operands = 0 : i64, tpu.core_type = #tpu.core_type<tc>, window_params = [{transform_indices = @transform_0, window_bounds = array<i64: 8, 8>}, {pipeline_mode = #tpu.pipeline_mode<synchronous>, transform_indices = @transform_1, window_bounds = array<i64: 8, 128>}, {pipeline_mode = #tpu.pipeline_mode<synchronous>, transform_indices = @transform_2, window_bounds = array<i64: 1, 128>}, {pipeline_mode = #tpu.pipeline_mode<synchronous>, transform_indices = @transform_3, window_bounds = array<i64: 128, 64>}, {pipeline_mode = #tpu.pipeline_mode<synchronous>, transform_indices = @transform_4, window_bounds = array<i64: 1, 64>}, {pipeline_mode = #tpu.pipeline_mode<synchronous>, transform_indices = @transform_5, window_bounds = array<i64: 64, 128>}, {pipeline_mode = #tpu.pipeline_mode<synchronous>, transform_indices = @transform_6, window_bounds = array<i64: 1, 128>}, {transform_indices = @transform_7, window_bounds = array<i64: 8, 128>}]} {
    %c0 = arith.constant 0 : index
    %c0_0 = arith.constant 0 : index
    %0 = vector.load %arg1[%c0, %c0_0] : memref<8x8xf32, #tpu.memory_space<vmem>>, vector<8x8xf32>
    %c0_1 = arith.constant 0 : index
    %c0_2 = arith.constant 0 : index
    %1 = vector.load %arg2[%c0_1, %c0_2] : memref<8x128xf32, #tpu.memory_space<vmem>>, vector<8x128xf32>
    %cst = arith.constant dense<0.000000e+00> : vector<8x128xf32>
    %2 = tpu.matmul %0, %1, %cst {dimension_numbers = #tpu.dot_dimension_numbers<[1], [0], [0], [1], [0, 0, 1, 1], [], []>} : vector<8x8xf32>, vector<8x128xf32>, vector<8x128xf32> -> vector<8x128xf32>
    %c0_3 = arith.constant 0 : index
    %c0_4 = arith.constant 0 : index
    %3 = vector.load %arg3[%c0_3, %c0_4] : memref<1x128xf32, #tpu.memory_space<vmem>>, vector<1x128xf32>
    %4 = vector.broadcast %3 : vector<1x128xf32> to vector<8x128xf32>
    %5 = arith.addf %2, %4 : vector<8x128xf32>
    %cst_5 = arith.constant 0.000000e+00 : f32
    %6 = vector.broadcast %cst_5 : f32 to vector<8x128xf32>
    %7 = arith.maximumf %5, %6 : vector<8x128xf32>
    %c0_6 = arith.constant 0 : index
    %c0_7 = arith.constant 0 : index
    %8 = vector.load %arg4[%c0_6, %c0_7] : memref<128x64xf32, #tpu.memory_space<vmem>>, vector<128x64xf32>
    %cst_8 = arith.constant dense<0.000000e+00> : vector<8x64xf32>
    %9 = tpu.matmul %7, %8, %cst_8 {dimension_numbers = #tpu.dot_dimension_numbers<[1], [0], [0], [1], [0, 0, 1, 1], [], []>} : vector<8x128xf32>, vector<128x64xf32>, vector<8x64xf32> -> vector<8x64xf32>
    %c0_9 = arith.constant 0 : index
    %c0_10 = arith.constant 0 : index
    %10 = vector.load %arg5[%c0_9, %c0_10] : memref<1x64xf32, #tpu.memory_space<vmem>>, vector<1x64xf32>
    %11 = vector.broadcast %10 : vector<1x64xf32> to vector<8x64xf32>
    %12 = arith.addf %9, %11 : vector<8x64xf32>
    %cst_11 = arith.constant 0.000000e+00 : f32
    %13 = vector.broadcast %cst_11 : f32 to vector<8x64xf32>
    %14 = arith.maximumf %12, %13 : vector<8x64xf32>
    %c0_12 = arith.constant 0 : index
    %c0_13 = arith.constant 0 : index
    %15 = vector.load %arg6[%c0_12, %c0_13] : memref<64x128xf32, #tpu.memory_space<vmem>>, vector<64x128xf32>
    %cst_14 = arith.constant dense<0.000000e+00> : vector<8x128xf32>
    %16 = tpu.matmul %14, %15, %cst_14 {dimension_numbers = #tpu.dot_dimension_numbers<[1], [0], [0], [1], [0, 0, 1, 1], [], []>} : vector<8x64xf32>, vector<64x128xf32>, vector<8x128xf32> -> vector<8x128xf32>
    %c0_15 = arith.constant 0 : index
    %c0_16 = arith.constant 0 : index
    %17 = vector.load %arg7[%c0_15, %c0_16] : memref<1x128xf32, #tpu.memory_space<vmem>>, vector<1x128xf32>
    %18 = vector.broadcast %17 : vector<1x128xf32> to vector<8x128xf32>
    %19 = arith.addf %16, %18 : vector<8x128xf32>
    %c0_17 = arith.constant 0 : index
    %c0_18 = arith.constant 0 : index
    %20 = vector.load %arg8[%c0_17, %c0_18] : memref<8x128xf32, #tpu.memory_space<vmem>>, vector<8x128xf32>
    tpu.vector_store %arg8[%c0_17, %c0_18], %19 {strides = array<i32>} : memref<8x128xf32, #tpu.memory_space<vmem>>, vector<8x128xf32>,
    return
  }
  func.func @transform_0(%arg0: i32) -> (i32, i32) {
    %c0_i32 = arith.constant 0 : i32
    %c0_i32_0 = arith.constant 0 : i32
    return %arg0, %c0_i32 : i32, i32
  }
  func.func @transform_1(%arg0: i32) -> (i32, i32) {
    %c0_i32 = arith.constant 0 : i32
    %c0_i32_0 = arith.constant 0 : i32
    %c0_i32_1 = arith.constant 0 : i32
    return %c0_i32, %c0_i32_0 : i32, i32
  }
  func.func @transform_2(%arg0: i32) -> (i32, i32) {
    %c0_i32 = arith.constant 0 : i32
    %c0_i32_0 = arith.constant 0 : i32
    %c0_i32_1 = arith.constant 0 : i32
    return %c0_i32, %c0_i32_0 : i32, i32
  }
  func.func @transform_3(%arg0: i32) -> (i32, i32) {
    %c0_i32 = arith.constant 0 : i32
    %c0_i32_0 = arith.constant 0 : i32
    %c0_i32_1 = arith.constant 0 : i32
    return %c0_i32, %c0_i32_0 : i32, i32
  }
  func.func @transform_4(%arg0: i32) -> (i32, i32) {
    %c0_i32 = arith.constant 0 : i32
    %c0_i32_0 = arith.constant 0 : i32
    %c0_i32_1 = arith.constant 0 : i32
    return %c0_i32, %c0_i32_0 : i32, i32
  }
  func.func @transform_5(%arg0: i32) -> (i32, i32) {
    %c0_i32 = arith.constant 0 : i32
    %c0_i32_0 = arith.constant 0 : i32
    %c0_i32_1 = arith.constant 0 : i32
    return %c0_i32, %c0_i32_0 : i32, i32
  }
  func.func @transform_6(%arg0: i32) -> (i32, i32) {
    %c0_i32 = arith.constant 0 : i32
    %c0_i32_0 = arith.constant 0 : i32
    %c0_i32_1 = arith.constant 0 : i32
    return %c0_i32, %c0_i32_0 : i32, i32
  }
  func.func @transform_7(%arg0: i32) -> (i32, i32) {
    %c0_i32 = arith.constant 0 : i32
    %c0_i32_0 = arith.constant 0 : i32
    return %arg0, %c0_i32 : i32, i32
  }
}

</mosaic_0001>

<bundles_post_ra>
// kernel: actor_critic_forward.1
= control target key start
LH: loop header
LB: loop body
LE: loop exit
PB: predicated region body
PF: predicated region fallthrough
CT: control target
= control target key end

     0   :  { %vm35_vm0 = vcmask 64512   ;;  %v429_v0 = vmov 0.0   ;;  %vm430_vm1 = vmmov 0   ;;  %v431_v4 = vmov 0.0|0.0   ;;  %s562_s1 = inlined_call_operand.vmem [shape: f32[8,128], index: 1, kind: input, shape index: {}]   ;;  %s563_s0 = inlined_call_operand.vmem [shape: f32[8,8], index: 0, kind: input, shape index: {}]   ;;  %s564_s3 = inlined_call_operand.vmem [shape: f32[128,64], index: 3, kind: input, shape index: {}]   ;;  %s565_s5 = inlined_call_operand.vmem [shape: f32[64,128], index: 5, kind: input, shape index: {}]   ;;  %s566_s2 = inlined_call_operand.vmem [shape: f32[1,128], index: 2, kind: input, shape index: {}]   ;;  %s567_s4 = inlined_call_operand.vmem [shape: f32[1,64], index: 4, kind: input, shape index: {}]   ;;  %s568_s6 = inlined_call_operand.vmem [shape: f32[1,128], index: 6, kind: input, shape index: {}]   ;;  %s569_s7 = inlined_call_operand.vmem [shape: f32[8,128], index: 7, kind: output, shape index: {}]  }
   0x1   :  { %331 = vmatprep.subr.mxu0 %v429_v0  ;;  %v27_v1 = vld [vmem:[%s562_s1] sm:$0xff]  ;;  %333 = vmatprep.mubr.msk.f32.mxu0 %vm430_vm1, %v429_v0  ;;  %v111_v5 = vld [vmem:[%s564_s3 + $0x8] sm:$0xff]  ;;  %v112_v6 = vld [vmem:[%s564_s3 + $0x10] sm:$0xff]  ;;  %vm219_vm2 = vcmask 523264  }
   0x2   :  { %v26_v2 = vld [vmem:[%s563_s0] sm:$0xff]  ;;  %332 = vmatpush3.msra.mxu0 %v27_v1  ;;  %390 = vmatprep.subr.bf16.mxu1 %v431_v4  ;;  %v113_v7 = vld [vmem:[%s564_s3 + $0x18] sm:$0xff]  ;;  %v115_v11 = vld [vmem:[%s564_s3 + $0x28] sm:$0xff] }
   0x3   :  { %v110_v3 = vld [vmem:[%s564_s3] sm:$0xff]  ;;  %334 = vmatmul.mubr.msk.f32.vlgmr.msra.gmra.mrb[0].mxu0 %vm35_vm0, %v26_v2  ;;  %368 = vmatprep.mubr.msk.f32.mxu1 %vm430_vm1, %v429_v0  ;;  %v394_v9 = vpack.c.bf16 %v113_v7, %v112_v6  ;;  %v116_v13 = vld [vmem:[%s564_s3 + $0x30] sm:$0xff]  ;;  %v117_v14 = vld [vmem:[%s564_s3 + $0x38] sm:$0xff] }
   0x4   :  { %v391_v8 = vpack.c.bf16 %v111_v5, %v110_v3  ;;  %414 = vmatprep.subr.bf16.mxu0 %v431_v4  ;;  %387 = vmatprep.mubr.msk.f32.mxu0 %vm430_vm1, %v429_v0  ;;  %v114_v10 = vld [vmem:[%s564_s3 + $0x20] sm:$0xff]  ;;  %v400_v15 = vpack.c.bf16 %v117_v14, %v116_v13  ;;  %v119_v17 = vld [vmem:[%s564_s3 + $0x48] sm:$0xff]  ;;  %v120_v19 = vld [vmem:[%s564_s3 + $0x50] sm:$0xff] }
   0x5   :  { %v397_v12 = vpack.c.bf16 %v115_v11, %v114_v10  ;;  %v118_v16 = vld [vmem:[%s564_s3 + $0x40] sm:$0xff]  ;;  %v121_v20 = vld [vmem:[%s564_s3 + $0x58] sm:$0xff]  ;;  %v123_v23 = vld [vmem:[%s564_s3 + $0x68] sm:$0xff] }
   0x6   :  { %392 = vmatpush3.bf16.msra.mxu1 %v391_v8  ;;  %v403_v18 = vpack.c.bf16 %v119_v17, %v118_v16  ;;  %v406_v21 = vpack.c.bf16 %v121_v20, %v120_v19  ;;  %v122_v22 = vld [vmem:[%s564_s3 + $0x60] sm:$0xff]  ;;  %v124_v25 = vld [vmem:[%s564_s3 + $0x70] sm:$0xff]  ;;  %v125_v26 = vld [vmem:[%s564_s3 + $0x78] sm:$0xff] }
   0x7   :  { %393 = vmatprep.subr.bf16.mxu1 %v431_v4  ;;  %v409_v24 = vpack.c.bf16 %v123_v23, %v122_v22  ;;  %v412_v27 = vpack.c.bf16 %v125_v26, %v124_v25  ;;  %v204_v28 = vld [vmem:[%s565_s5] sm:$0xff]  ;;  %v205_v29 = vld [vmem:[%s565_s5 + $0x8] sm:$0xff]  ;;  %v206_v30 = vld [vmem:[%s565_s5 + $0x10] sm:$0xff] }
   0x8   :  { %v415_v31 = vpack.c.bf16 %v205_v29, %v204_v28  ;;  %v207_v32 = vld [vmem:[%s565_s5 + $0x18] sm:$0xff]  ;;  %v208_v34 = vld [vmem:[%s565_s5 + $0x20] sm:$0xff]  ;;  %v209_v35 = vld [vmem:[%s565_s5 + $0x28] sm:$0xff] }
   0x9   :  { %v418_v33 = vpack.c.bf16 %v207_v32, %v206_v30  ;;  %v421_v36 = vpack.c.bf16 %v209_v35, %v208_v34  ;;  %v298_v37 = vld [vmem:[%s566_s2] ss:$0 sm:$0xff]  ;;  %v210_v42 = vld [vmem:[%s565_s5 + $0x30] sm:$0xff]  ;;  %v211_v43 = vld [vmem:[%s565_s5 + $0x38] sm:$0xff] }
   0xa   :  { %395 = vmatpush3.bf16.msra.mxu1 %v394_v9  ;;  %416 = vmatpush3.bf16.msra.mxu0 %v415_v31  ;;  %v424_v44 = vpack.c.bf16 %v211_v43, %v210_v42  ;;  %v300_v45 = vld [vmem:[%s567_s4] ss:$0 sm:$0xff] }
   0xb   :  { %396 = vmatprep.subr.bf16.mxu1 %v431_v4  ;;  %417 = vmatprep.subr.bf16.mxu0 %v431_v4  ;;  %v301_v50 = vld [vmem:[%s568_s6] ss:$0 sm:$0xff] }
   0xe   :  { %398 = vmatpush3.bf16.msra.mxu1 %v397_v12  ;;  %419 = vmatpush3.bf16.msra.mxu0 %v418_v33 }
   0xf   :  { %399 = vmatprep.subr.bf16.mxu1 %v431_v4  ;;  %420 = vmatprep.subr.bf16.mxu0 %v431_v4 }
  0x12   :  { %401 = vmatpush3.bf16.msra.mxu1 %v400_v15  ;;  %422 = vmatpush3.bf16.msra.mxu0 %v421_v36 }
  0x13   :  { %402 = vmatprep.subr.bf16.mxu1 %v431_v4  ;;  %423 = vmatprep.subr.bf16.mxu0 %v431_v4 }
  0x16   :  { %404 = vmatpush3.bf16.msra.mxu1 %v403_v18  ;;  %425 = vmatpush3.bf16.msra.mxu0 %v424_v44 }
  0x17   :  { %405 = vmatprep.subr.bf16.mxu1 %v431_v4 }
  0x1a   :  { %407 = vmatpush3.bf16.msra.mxu1 %v406_v21 }
  0x1b   :  { %408 = vmatprep.subr.bf16.mxu1 %v431_v4 }
  0x1e   :  { %410 = vmatpush3.bf16.msra.mxu1 %v409_v24 }
  0x1f   :  { %411 = vmatprep.subr.bf16.mxu1 %v431_v4 }
  0x22   :  { %413 = vmatpush3.bf16.msra.mxu1 %v412_v27 }
  0xd6   :  { %v105_v38 = vpop.f32.mrb[0].mxu0 }
  0xd7   :  { %v106_v39 = vadd.f32 %v298_v37, %v105_v38  ;;  %v335_v40 = vpop.f32.mrb[1].mxu0 }
  0xd9   :  { %v109_v41 = vmax.f32 %v106_v39, 0.0 }
  0xdb   :  { %369 = vmatmul.mubr.f32.vlgmr.msra.gmra.mrb[0].mxu1 %v109_v41 }
 0x1ae   :  { %v199_v46 = vpop.f32.mrb[0].mxu1 }
 0x1af   :  { %v200_v47 = vadd.f32 %v300_v45, %v199_v46  ;;  %v370_v48 = vpop.f32.mrb[1].mxu1 }
 0x1b1   :  { %v203_v49 = vmax.f32 %v200_v47, 0.0 }
 0x1b3   :  { %388 = vmatmul.mubr.msk.f32.vlgmr.msra.gmra.mrb[2].mxu0 %vm219_vm2, %v203_v49 }
 0x286   :  { %v289_v51 = vpop.f32.mrb[2].mxu0 }
 0x287   :  { %v290_v52 = vadd.f32 %v301_v50, %v289_v51  ;;  %v389_v53 = vpop.f32.mrb[3].mxu0 }
 0x289   :  { %293 = vst [vmem:[%s569_s7] sm:$0xff] %v290_v52 }

</bundles_post_ra>
